<compile_context>
chip_gen: v5e
topology: v5e:2x2
jax: 0.10.0
libtpu: 0.0.40
codegen_flags: <defaults>
</compile_context>

<pallas_src>
import jax
import jax.numpy as jnp
from jax import lax
from jax.experimental import pallas as pl
from jax.experimental.pallas import tpu as pltpu


_INV_SQRT2 = 0.7071067811865476  # GELU constant, kept in f32


def _gelu_exact(x):
    # PyTorch nn.GELU() default (approximate='none'): 0.5*x*(1+erf(x/sqrt(2)))
    return 0.5 * x * (1.0 + lax.erf(x * _INV_SQRT2))


def _round_up(v, m):
    return ((v + m - 1) // m) * m


# --------------------------------------------------------------------------- kernel
def _mlp_embedding_kernel(x_ref, w1_ref, w2_ref, o_ref, h_ref):
    # x_ref:  (tn, k_aug)   row tile of packed inputs, trailing lane == 1.0
    # w1_ref: (k_aug, d)    resident; last row is (tiled) b1  -> bias folded
    # w2_ref: (d + 1, tnd)  column block; last row is the b2 chunk -> bias folded
    # o_ref:  (tn, tnd)     output tile
    # h_ref:  (tn, d + 1)   f32 scratch: GELU activations + constant-1 lane
    d = w1_ref.shape[1]

    # First linear + GELU only once per row tile (inner grid axis j streams W2).
    @pl.when(pl.program_id(1) == 0)
    def _():
        h = jnp.dot(x_ref[...].astype(jnp.float32),
                    w1_ref[...].astype(jnp.float32),
                    preferred_element_type=jnp.float32)
        h_ref[:, :d] = _gelu_exact(h)
        h_ref[:, d:] = jnp.ones((h_ref.shape[0], 1), jnp.float32)

    y = jnp.dot(h_ref[...], w2_ref[...].astype(jnp.float32),
                preferred_element_type=jnp.float32)
    o_ref[...] = y.astype(o_ref.dtype)


# ------------------------------------------------------------------- tiling helpers
def _vmem_budget_bytes():
    """Generation-aware VMEM budget: v4/v5e/v6e have 128 MiB per core, v7x has 64."""
    try:
        kind = jax.devices()[0].device_kind.lower()
    except Exception:
        kind = ""
    if any(tag in kind for tag in ("v4", "v5", "v6")):
        return 96 * 1024 * 1024
    return 48 * 1024 * 1024   # conservative (safe on v7x's 64 MiB physical VMEM)


def _choose_tiles(n_rows, k_aug, d, block_rows, budget, w2_resident_bytes):
    """Pick (row tile tn, W2 column tile tnd) from the real VMEM footprint."""
    w2_bytes = (d + 1) * d * 4
    if d <= 256 or w2_bytes <= min(w2_resident_bytes, budget // 3):
        tnd = d                                    # W2 fully resident
    else:
        tnd = 512 if d >= 512 else _round_up(max(d // 2, 128), 128)
        while tnd > 128 and 2 * (d + 1) * tnd * 4 > budget // 3:
            tnd //= 2                              # stream smaller column blocks
    col_tiles = pl.cdiv(d, tnd)

    def footprint(tn):
        x_b = 2 * tn * k_aug * 4                            # x, double-buffered
        o_b = 2 * tn * tnd * 4                              # out, double-buffered
        w1_b = k_aug * d * 4                                # resident W1
        w2_b = (2 if col_tiles > 1 else 1) * (d + 1) * tnd * 4
        h_b = tn * (d + 1) * 4                              # activation scratch
        tmp_b = tn * d * 4 + tn * tnd * 4                   # gelu / y temporaries
        return x_b + o_b + w1_b + w2_b + h_b + tmp_b

    tn = min(block_rows, n_rows)
    if n_rows > 8:
        # Keep >= 2 steps on the parallel row axis so a 2nd TensorCore (v7x) has work.
        tn = min(tn, _round_up(pl.cdiv(n_rows, 2), 8))
        tn = max(8, (tn // 8) * 8)
    while tn > 8 and footprint(tn) > int(0.75 * budget):
        tn = max(8, ((tn // 2) // 8) * 8)
    return tn, tnd


# ------------------------------------------------------------------ weight packing
def pack_mlp_embedding_params(w1, b1, w2, b2):
    """Pack weights once: lane-density packing + bias folding (cache across calls)."""
    input_dim, embed_dim = w1.shape
    g = 1
    if embed_dim < 128 and 128 % embed_dim == 0:
        g = 128 // embed_dim            # logical rows packed per 128-lane physical row

    if g > 1:
        eye = jnp.eye(g, dtype=w1.dtype)
        w1p = jnp.kron(eye, w1)                               # (g*in, g*E) block-diag
        w2p = jnp.kron(jnp.eye(g, dtype=w2.dtype), w2)        # (g*E, g*E) block-diag
        b1p = jnp.tile(b1.reshape(1, embed_dim), (1, g))      # (1, g*E)
        b2p = jnp.tile(b2.reshape(1, embed_dim), (1, g))      # (1, g*E)
    else:
        w1p, w2p = w1, w2
        b1p = b1.reshape(1, embed_dim)
        b2p = b2.reshape(1, embed_dim)

    # Fold biases in as extra weight rows (driven by constant-1 lanes).
    w1_aug = jnp.concatenate([w1p, b1p], axis=0)              # (g*in + 1, g*E)
    w2_aug = jnp.concatenate([w2p, b2p], axis=0)              # (g*E + 1, g*E)
    return dict(w1_aug=w1_aug, w2_aug=w2_aug, g=g,
                input_dim=input_dim, embed_dim=embed_dim)


# ------------------------------------------------------------------------ execution
def _run_packed(x, params, *, block_rows=512, w2_resident_bytes=8 * 1024 * 1024,
                interpret=False):
    g = params["g"]
    input_dim = params["input_dim"]
    embed_dim = params["embed_dim"]
    w1_aug, w2_aug = params["w1_aug"], params["w2_aug"]

    x2d = x.reshape(-1, input_dim)
    n = x2d.shape[0]

    # Always keep the lane-dense path: zero-pad ragged batches to a multiple of g.
    n_pad = _round_up(max(n, 1), g)
    if n_pad != n:
        x2d = jnp.concatenate(
            [x2d, jnp.zeros((n_pad - n, input_dim), x2d.dtype)], axis=0)

    n_rows = n_pad // g
    k_aug = g * input_dim + 1
    d = g * embed_dim

    # Pack g logical rows per physical row (free row-major reshape) and append the
    # constant-1 lane that drives the folded b1 row of w1_aug.
    x_pk = x2d.reshape(n_rows, g * input_dim)
    x_pk = jnp.concatenate([x_pk, jnp.ones((n_rows, 1), x_pk.dtype)], axis=1)

    budget = _vmem_budget_bytes()
    tn, tnd = _choose_tiles(n_rows, k_aug, d, block_rows, budget, w2_resident_bytes)
    grid = (pl.cdiv(n_rows, tn), pl.cdiv(d, tnd))

    def build(single_buffer_weights):
        w_mode = {"pipeline_mode": pl.Buffered(1)} if single_buffer_weights else {}
        return pl.pallas_call(
            _mlp_embedding_kernel,
            out_shape=jax.ShapeDtypeStruct((n_rows, d), x2d.dtype),
            grid=grid,
            in_specs=[
                pl.BlockSpec((tn, k_aug), lambda i, j: (i, 0)),             # x tile
                pl.BlockSpec((k_aug, d), lambda i, j: (0, 0), **w_mode),    # W1 (+b1)
                pl.BlockSpec((d + 1, tnd), lambda i, j: (0, j),             # W2 (+b2)
                             **(w_mode if grid[1] == 1 else {})),
            ],
            out_specs=pl.BlockSpec((tn, tnd), lambda i, j: (i, j)),
            scratch_shapes=[pltpu.VMEM((tn, d + 1), jnp.float32)],
            compiler_params=pltpu.CompilerParams(
                dimension_semantics=("parallel", "arbitrary"),
                vmem_limit_bytes=budget,
            ),
            interpret=interpret,
        )

    try:
        out = build(True)(x_pk, w1_aug, w2_aug)
    except Exception:
        # pipeline_mode=pl.Buffered(1) is best-effort VMEM savings; fall back to the
        # default double-buffered specs if this JAX/Mosaic build rejects it.
        out = build(False)(x_pk, w1_aug, w2_aug)

    out = out.reshape(n_pad, embed_dim)
    if n_pad != n:
        out = out[:n]
    return out


class MLPEmbeddingKernel:
    """Linear -> GELU(erf) -> Linear, with weights packed once at construction."""

    def __init__(self, w1, b1, w2, b2, *, block_rows=512,
                 w2_resident_bytes=8 * 1024 * 1024, interpret=False):
        self.params = pack_mlp_embedding_params(w1, b1, w2, b2)
        self.block_rows = block_rows
        self.w2_resident_bytes = w2_resident_bytes
        self.interpret = interpret

    def __call__(self, x):
        return _run_packed(x, self.params, block_rows=self.block_rows,
                           w2_resident_bytes=self.w2_resident_bytes,
                           interpret=self.interpret)


def mlp_embedding(x, w1, b1, w2, b2, *, block_rows=512):
    """One-shot convenience wrapper (re-packs the weights every call)."""
    return _run_packed(x, pack_mlp_embedding_params(w1, b1, w2, b2),
                       block_rows=block_rows)


# ------------------------------------------------------------------------ reference
def init_params(key, input_dim, embed_dim, dtype=jnp.float32):
    """PyTorch Linear default init: U[-1/sqrt(fan_in), 1/sqrt(fan_in)]."""
    k1, k2, k3, k4 = jax.random.split(key, 4)
    bound1 = 1.0 / (input_dim ** 0.5)
    bound2 = 1.0 / (embed_dim ** 0.5)
    w1 = jax.random.uniform(k1, (input_dim, embed_dim), dtype, -bound1, bound1)
    b1 = jax.random.uniform(k2, (embed_dim,), dtype, -bound1, bound1)
    w2 = jax.random.uniform(k3, (embed_dim, embed_dim), dtype, -bound2, bound2)
    b2 = jax.random.uniform(k4, (embed_dim,), dtype, -bound2, bound2)
    return w1, b1, w2, b2


def mlp_embedding_ref(x, w1, b1, w2, b2):
    input_dim = w1.shape[0]
    x2d = x.reshape(-1, input_dim)
    h = x2d @ w1 + b1
    h = 0.5 * h * (1.0 + lax.erf(h / jnp.sqrt(2.0)))
    return h @ w2 + b2


if __name__ == "__main__":
    key = jax.random.PRNGKey(0)
    input_dim, embed_dim = 4, 32

    kx, kp = jax.random.split(key)
    w1, b1, w2, b2 = init_params(kp, input_dim, embed_dim)
    mod = MLPEmbeddingKernel(w1, b1, w2, b2)

    # (batch=2, seq=8, input_dim=4) -> 16 rows; embed_dim=32 < 128 so the wrapper
    # packs 4 logical rows per 128-lane physical row (lane-dense output path).
    x = jax.random.normal(kx, (2, 8, input_dim), jnp.float32)
    out = jax.block_until_ready(mod(x))
    ref = mlp_embedding_ref(x, w1, b1, w2, b2)
    assert out.shape == (16, embed_dim), out.shape
    assert jnp.allclose(out, ref, atol=1e-5, rtol=1e-5), (
        float(jnp.max(jnp.abs(out - ref))))

    # Ragged batch (n=6 not divisible by g=4): padded to 8 rows, packed anyway,
    # output sliced back (no fallback to masked 32-lane stores).
    x_rag = jax.random.normal(kx, (6, input_dim), jnp.float32)
    out_rag = jax.block_until_ready(mod(x_rag))
    ref_rag = mlp_embedding_ref(x_rag, w1, b1, w2, b2)
    assert out_rag.shape == (6, embed_dim), out_rag.shape
    assert jnp.allclose(out_rag, ref_rag, atol=1e-5, rtol=1e-5), (
        float(jnp.max(jnp.abs(out_rag - ref_rag))))

    # Exercise the W2 column-streaming path (forced resident threshold = 0):
    # embed_dim=640 -> 2 column blocks of 512, 2 row tiles (second one partial).
    input_dim2, embed_dim2 = 4, 640
    w1s, b1s, w2s, b2s = init_params(kp, input_dim2, embed_dim2)
    mod_stream = MLPEmbeddingKernel(w1s, b1s, w2s, b2s, w2_resident_bytes=0)
    x_s = jax.random.normal(kx, (40, input_dim2), jnp.float32)
    out_s = jax.block_until_ready(mod_stream(x_s))
    ref_s = mlp_embedding_ref(x_s, w1s, b1s, w2s, b2s)
    assert out_s.shape == (40, embed_dim2), out_s.shape
    assert jnp.allclose(out_s, ref_s, atol=1e-4, rtol=1e-4), (
        float(jnp.max(jnp.abs(out_s - ref_s))))

    print("KERNEL_OK")
</pallas_src>

<mosaic_0001>
module attributes {stable_mosaic.version = 11 : i64} {
  func.func @_mlp_embedding_kernel(%arg0: i32, %arg1: i32, %arg2: memref<4x17xf32, #tpu.memory_space<vmem>>, %arg3: memref<17x128xf32, #tpu.memory_space<vmem>>, %arg4: memref<129x128xf32, #tpu.memory_space<vmem>>, %arg5: memref<4x128xf32, #tpu.memory_space<vmem>>, %arg6: memref<4x129xf32, #tpu.memory_space<vmem>>) attributes {dimension_semantics = [#tpu.dimension_semantics<parallel>, #tpu.dimension_semantics<arbitrary>], iteration_bounds = array<i64: 1, 1>, scalar_prefetch = 0 : i64, scratch_operands = 1 : i64, tpu.core_type = #tpu.core_type<tc>, window_params = [{transform_indices = @transform_0, window_bounds = array<i64: 4, 17>}, {pipeline_mode = #tpu.pipeline_mode<synchronous>, transform_indices = @transform_1, window_bounds = array<i64: 17, 128>}, {pipeline_mode = #tpu.pipeline_mode<synchronous>, transform_indices = @transform_2, window_bounds = array<i64: 129, 128>}, {transform_indices = @transform_3, window_bounds = array<i64: 4, 128>}]} {
    %c0_i32 = arith.constant 0 : i32
    %0 = arith.cmpi eq, %arg1, %c0_i32 : i32
    %1 = arith.extui %0 : i1 to i32
    %c0_i32_0 = arith.constant 0 : i32
    %2 = arith.cmpi ne, %1, %c0_i32_0 : i32
    scf.if %2 {
      %c0_6 = arith.constant 0 : index
      %c0_7 = arith.constant 0 : index
      %7 = vector.load %arg2[%c0_6, %c0_7] : memref<4x17xf32, #tpu.memory_space<vmem>>, vector<4x17xf32>
      %c0_8 = arith.constant 0 : index
      %c0_9 = arith.constant 0 : index
      %8 = vector.load %arg3[%c0_8, %c0_9] : memref<17x128xf32, #tpu.memory_space<vmem>>, vector<17x128xf32>
      %cst_10 = arith.constant dense<0.000000e+00> : vector<4x128xf32>
      %9 = tpu.matmul %7, %8, %cst_10 {dimension_numbers = #tpu.dot_dimension_numbers<[1], [0], [0], [1], [0, 0, 1, 1], [], []>} : vector<4x17xf32>, vector<17x128xf32>, vector<4x128xf32> -> vector<4x128xf32>
      %cst_11 = arith.constant 5.000000e-01 : f32
      %10 = vector.broadcast %cst_11 : f32 to vector<4x128xf32>
      %11 = arith.mulf %10, %9 : vector<4x128xf32>
      %cst_12 = arith.constant 0.707106769 : f32
      %12 = vector.broadcast %cst_12 : f32 to vector<4x128xf32>
      %13 = arith.mulf %9, %12 : vector<4x128xf32>
      %14 = math.erf %13 : vector<4x128xf32>
      %cst_13 = arith.constant 1.000000e+00 : f32
      %15 = vector.broadcast %cst_13 : f32 to vector<4x128xf32>
      %16 = arith.addf %15, %14 : vector<4x128xf32>
      %17 = arith.mulf %11, %16 : vector<4x128xf32>
      %c0_14 = arith.constant 0 : index
      %c0_15 = arith.constant 0 : index
      %18 = vector.load %arg6[%c0_14, %c0_15] : memref<4x129xf32, #tpu.memory_space<vmem>>, vector<4x128xf32>
      tpu.vector_store %arg6[%c0_14, %c0_15], %17 {strides = array<i32>} : memref<4x129xf32, #tpu.memory_space<vmem>>, vector<4x128xf32>,
      %cst_16 = arith.constant 1.000000e+00 : f32
      %19 = vector.broadcast %cst_16 : f32 to vector<4x1xf32>
      %c0_17 = arith.constant 0 : index
      %c128 = arith.constant 128 : index
      %20 = vector.load %arg6[%c0_17, %c128] : memref<4x129xf32, #tpu.memory_space<vmem>>, vector<4x1xf32>
      tpu.vector_store %arg6[%c0_17, %c128], %19 {strides = array<i32>} : memref<4x129xf32, #tpu.memory_space<vmem>>, vector<4x1xf32>,
    } else {
    }
    %c0 = arith.constant 0 : index
    %c0_1 = arith.constant 0 : index
    %3 = vector.load %arg6[%c0, %c0_1] : memref<4x129xf32, #tpu.memory_space<vmem>>, vector<4x129xf32>
    %c0_2 = arith.constant 0 : index
    %c0_3 = arith.constant 0 : index
    %4 = vector.load %arg4[%c0_2, %c0_3] : memref<129x128xf32, #tpu.memory_space<vmem>>, vector<129x128xf32>
    %cst = arith.constant dense<0.000000e+00> : vector<4x128xf32>
    %5 = tpu.matmul %3, %4, %cst {dimension_numbers = #tpu.dot_dimension_numbers<[1], [0], [0], [1], [0, 0, 1, 1], [], []>} : vector<4x129xf32>, vector<129x128xf32>, vector<4x128xf32> -> vector<4x128xf32>
    %c0_4 = arith.constant 0 : index
    %c0_5 = arith.constant 0 : index
    %6 = vector.load %arg5[%c0_4, %c0_5] : memref<4x128xf32, #tpu.memory_space<vmem>>, vector<4x128xf32>
    tpu.vector_store %arg5[%c0_4, %c0_5], %5 {strides = array<i32>} : memref<4x128xf32, #tpu.memory_space<vmem>>, vector<4x128xf32>,
    return
  }
  func.func @transform_0(%arg0: i32, %arg1: i32) -> (i32, i32) {
    %c0_i32 = arith.constant 0 : i32
    %c0_i32_0 = arith.constant 0 : i32
    return %arg0, %c0_i32 : i32, i32
  }
  func.func @transform_1(%arg0: i32, %arg1: i32) -> (i32, i32) {
    %c0_i32 = arith.constant 0 : i32
    %c0_i32_0 = arith.constant 0 : i32
    %c0_i32_1 = arith.constant 0 : i32
    return %c0_i32, %c0_i32_0 : i32, i32
  }
  func.func @transform_2(%arg0: i32, %arg1: i32) -> (i32, i32) {
    %c0_i32 = arith.constant 0 : i32
    %c0_i32_0 = arith.constant 0 : i32
    return %c0_i32, %arg1 : i32, i32
  }
  func.func @transform_3(%arg0: i32, %arg1: i32) -> (i32, i32) {
    %c0_i32 = arith.constant 0 : i32
    return %arg0, %arg1 : i32, i32
  }
}

module attributes {stable_mosaic.version = 11 : i64} {
  func.func @_mlp_embedding_kernel(%arg0: i32, %arg1: i32, %arg2: memref<4x17xf32, #tpu.memory_space<vmem>>, %arg3: memref<17x128xf32, #tpu.memory_space<vmem>>, %arg4: memref<129x128xf32, #tpu.memory_space<vmem>>, %arg5: memref<4x128xf32, #tpu.memory_space<vmem>>, %arg6: memref<4x129xf32, #tpu.memory_space<vmem>>) attributes {dimension_semantics = [#tpu.dimension_semantics<parallel>, #tpu.dimension_semantics<arbitrary>], iteration_bounds = array<i64: 1, 1>, scalar_prefetch = 0 : i64, scratch_operands = 1 : i64, tpu.core_type = #tpu.core_type<tc>, window_params = [{transform_indices = @transform_0, window_bounds = array<i64: 4, 17>}, {pipeline_mode = #tpu.pipeline_mode<synchronous>, transform_indices = @transform_1, window_bounds = array<i64: 17, 128>}, {transform_indices = @transform_2, window_bounds = array<i64: 129, 128>}, {transform_indices = @transform_3, window_bounds = array<i64: 4, 128>}]} {
    %c0_i32 = arith.constant 0 : i32
    %0 = arith.cmpi eq, %arg1, %c0_i32 : i32
    %1 = arith.extui %0 : i1 to i32
    %c0_i32_0 = arith.constant 0 : i32
    %2 = arith.cmpi ne, %1, %c0_i32_0 : i32
    scf.if %2 {
      %c0_6 = arith.constant 0 : index
      %c0_7 = arith.constant 0 : index
      %7 = vector.load %arg2[%c0_6, %c0_7] : memref<4x17xf32, #tpu.memory_space<vmem>>, vector<4x17xf32>
      %c0_8 = arith.constant 0 : index
      %c0_9 = arith.constant 0 : index
      %8 = vector.load %arg3[%c0_8, %c0_9] : memref<17x128xf32, #tpu.memory_space<vmem>>, vector<17x128xf32>
      %cst_10 = arith.constant dense<0.000000e+00> : vector<4x128xf32>
      %9 = tpu.matmul %7, %8, %cst_10 {dimension_numbers = #tpu.dot_dimension_numbers<[1], [0], [0], [1], [0, 0, 1, 1], [], []>} : vector<4x17xf32>, vector<17x128xf32>, vector<4x128xf32> -> vector<4x128xf32>
      %cst_11 = arith.constant 5.000000e-01 : f32
      %10 = vector.broadcast %cst_11 : f32 to vector<4x128xf32>
      %11 = arith.mulf %10, %9 : vector<4x128xf32>
      %cst_12 = arith.constant 0.707106769 : f32
      %12 = vector.broadcast %cst_12 : f32 to vector<4x128xf32>
      %13 = arith.mulf %9, %12 : vector<4x128xf32>
      %14 = math.erf %13 : vector<4x128xf32>
      %cst_13 = arith.constant 1.000000e+00 : f32
      %15 = vector.broadcast %cst_13 : f32 to vector<4x128xf32>
      %16 = arith.addf %15, %14 : vector<4x128xf32>
      %17 = arith.mulf %11, %16 : vector<4x128xf32>
      %c0_14 = arith.constant 0 : index
      %c0_15 = arith.constant 0 : index
      %18 = vector.load %arg6[%c0_14, %c0_15] : memref<4x129xf32, #tpu.memory_space<vmem>>, vector<4x128xf32>
      tpu.vector_store %arg6[%c0_14, %c0_15], %17 {strides = array<i32>} : memref<4x129xf32, #tpu.memory_space<vmem>>, vector<4x128xf32>,
      %cst_16 = arith.constant 1.000000e+00 : f32
      %19 = vector.broadcast %cst_16 : f32 to vector<4x1xf32>
      %c0_17 = arith.constant 0 : index
      %c128 = arith.constant 128 : index
      %20 = vector.load %arg6[%c0_17, %c128] : memref<4x129xf32, #tpu.memory_space<vmem>>, vector<4x1xf32>
      tpu.vector_store %arg6[%c0_17, %c128], %19 {strides = array<i32>} : memref<4x129xf32, #tpu.memory_space<vmem>>, vector<4x1xf32>,
    } else {
    }
    %c0 = arith.constant 0 : index
    %c0_1 = arith.constant 0 : index
    %3 = vector.load %arg6[%c0, %c0_1] : memref<4x129xf32, #tpu.memory_space<vmem>>, vector<4x129xf32>
    %c0_2 = arith.constant 0 : index
    %c0_3 = arith.constant 0 : index
    %4 = vector.load %arg4[%c0_2, %c0_3] : memref<129x128xf32, #tpu.memory_space<vmem>>, vector<129x128xf32>
    %cst = arith.constant dense<0.000000e+00> : vector<4x128xf32>
    %5 = tpu.matmul %3, %4, %cst {dimension_numbers = #tpu.dot_dimension_numbers<[1], [0], [0], [1], [0, 0, 1, 1], [], []>} : vector<4x129xf32>, vector<129x128xf32>, vector<4x128xf32> -> vector<4x128xf32>
    %c0_4 = arith.constant 0 : index
    %c0_5 = arith.constant 0 : index
    %6 = vector.load %arg5[%c0_4, %c0_5] : memref<4x128xf32, #tpu.memory_space<vmem>>, vector<4x128xf32>
    tpu.vector_store %arg5[%c0_4, %c0_5], %5 {strides = array<i32>} : memref<4x128xf32, #tpu.memory_space<vmem>>, vector<4x128xf32>,
    return
  }
  func.func @transform_0(%arg0: i32, %arg1: i32) -> (i32, i32) {
    %c0_i32 = arith.constant 0 : i32
    %c0_i32_0 = arith.constant 0 : i32
    return %arg0, %c0_i32 : i32, i32
  }
  func.func @transform_1(%arg0: i32, %arg1: i32) -> (i32, i32) {
    %c0_i32 = arith.constant 0 : i32
    %c0_i32_0 = arith.constant 0 : i32
    %c0_i32_1 = arith.constant 0 : i32
    return %c0_i32, %c0_i32_0 : i32, i32
  }
  func.func @transform_2(%arg0: i32, %arg1: i32) -> (i32, i32) {
    %c0_i32 = arith.constant 0 : i32
    %c0_i32_0 = arith.constant 0 : i32
    return %c0_i32, %arg1 : i32, i32
  }
  func.func @transform_3(%arg0: i32, %arg1: i32) -> (i32, i32) {
    %c0_i32 = arith.constant 0 : i32
    return %arg0, %arg1 : i32, i32
  }
}

</mosaic_0001>

<bundles_post_ra>
// kernel: tpu_custom_call.1
= control target key start
LH: loop header
LB: loop body
LE: loop exit
PB: predicated region body
PF: predicated region fallthrough
CT: control target
= control target key end

     0   :  { %8 = vsyncpa [#allocation4], 0  ;;  %s398_s0 = inlined_call_operand.hbm [shape: f32[4,17], index: 0, kind: input, shape index: {}]   ;;  %s399_s1 = inlined_call_operand.hbm [shape: f32[17,128], index: 1, kind: input, shape index: {}]   ;;  %s400_s2 = inlined_call_operand.hbm [shape: f32[129,128], index: 2, kind: input, shape index: {}]   ;;  %s401_s3 = inlined_call_operand.hbm [shape: f32[4,128], index: 3, kind: output, shape index: {}]  }
   0x1   :  { %9 = vsyncpa [#allocation7], 0  ;;  %s26_s14 = sshll.u32 %s399_s1, 4  ;;  %s27_s14 = int_to_ptr.hbm [resolvable:$true] %s26_s14 }
   0x2   :  { %10 = vsyncpa [#allocation5], 0  ;;  %s348_s15 = smov [#allocation6]   ;;  %s16_s19 = sshll.u32 %s398_s0, 4  ;;  %s17_s19 = int_to_ptr.hbm [resolvable:$true] %s16_s19 }
   0x3   :  { %s28_s16 = sshll.u32 %s348_s15, 4  ;;  %s349_s20 = smov 128   ;;  %s29_s16 = int_to_ptr.vmem [resolvable:$true] %s28_s16 }
   0x4   :  { %s350_s21 = smov 8   ;;  %s351_s22 = smov [#allocation3]  }
   0x5   :  { %34 = dma.hbm_to_vmem [thread:$0]  %s27_s14, 384, %s29_s16, [#allocation7], %s349_s20, %s349_s20, %s350_s21  }
   0x6   :  { %s18_s23 = sshll.u32 %s351_s22, 4  ;;  %s39_s26 = sshll.u32 %s400_s2, 4  ;;  %s19_s23 = int_to_ptr.vmem [resolvable:$true] %s18_s23  ;;  %s40_s26 = int_to_ptr.hbm [resolvable:$true] %s39_s26 }
   0x7   :  { %21 = dma.hbm_to_vmem [thread:$0]  %s17_s19, 64, %s19_s23, [#allocation4]  }
   0x8   :  { %s352_s1 = smov [#allocation8]  }
   0x9   :  { %s41_s27 = sshll.u32 %s352_s1, 4  ;;  %s42_s27 = int_to_ptr.vmem [resolvable:$true] %s41_s27 }
   0xa   :  { %47 = dma.hbm_to_vmem [thread:$0]  %s40_s26, 2176, %s42_s27, [#allocation7], %s349_s20, %s349_s20, %s350_s21  }
   0xb   :  { %342 = dma.done.wait [#allocation4], 64  }
   0xc   :  { %343 = vsyncadd [#allocation4], 4294967232 }
   0xd   :  { %344 = dma.done.wait [#allocation7], 2560  }
   0xe   :  { %345 = vsyncadd [#allocation7], 4294964736  ;;  %vm72_vm0 = vcmask 1040384   ;;  %v67_v0 = vld [vmem:[#allocation6 + $0x10] sm:$0x1]  ;;  %v66_v1 = vld [vmem:[#allocation6 + $0x8] sm:$0xff] }
   0xf   :  { %232 = vmatpush.msk.msra.mxu0 %vm72_vm0, %v67_v0  ;;  %v65_v2 = vld [vmem:[#allocation6] sm:$0xff]  ;;  %v64_v3 = vld [vmem:[#allocation3] sm:$0xf]  ;;  %vm68_vm1 = vcmask 138240   ;;  %v159_v8 = vld [vmem:[#allocation8 + $0x78] sm:$0xff]  ;;  %vm141_vm2 = vcmask 3072  }
  0x10   :  { %173 = vmatpush.msra.mxu1 %v159_v8  ;;  %v158_v11 = vld [vmem:[#allocation8 + $0x70] sm:$0xff]  ;;  %v157_v14 = vld [vmem:[#allocation8 + $0x68] sm:$0xff]  ;;  %v156_v17 = vld [vmem:[#allocation8 + $0x60] sm:$0xff]  ;;  %v353_v32 = vmov 1.0   ;;  %vm166_vm7 = vcmask 7168   ;;  %s354_s0 = smov [#allocation9]  }
  0x11   :  { %90 = vmatpush.msra.mxu0 %v66_v1  ;;  %v155_v19 = vld [vmem:[#allocation8 + $0x58] sm:$0xff]  ;;  %v154_v22 = vld [vmem:[#allocation8 + $0x50] sm:$0xff]  ;;  %v153_v24 = vld [vmem:[#allocation8 + $0x48] sm:$0xff]  ;;  %142 = vst.msk [vmem:[#allocation2 + $0x4] sm:$0xf] %vm141_vm2, %v353_v32  ;;  %s219_s2 = sshll.u32 %s354_s0, 4  ;;  %s220_s2 = int_to_ptr.vmem [resolvable:$true] %s219_s2 }
  0x12   :  { %174 = vmatpush.msra.mxu1 %v158_v11  ;;  %v152_v27 = vld [vmem:[#allocation8 + $0x40] sm:$0xff]  ;;  %v151_v28 = vld [vmem:[#allocation8 + $0x38] sm:$0xff]  ;;  %v150_v30 = vld [vmem:[#allocation8 + $0x30] sm:$0xff]  ;;  %s221_s30 = sshll.u32 %s401_s3, 4  ;;  %s222_s30 = int_to_ptr.hbm [resolvable:$true] %s221_s30 }
  0x13   :  { %91 = vmatpush.msra.mxu0 %v65_v2  ;;  %v149_v34 = vld [vmem:[#allocation8 + $0x28] sm:$0xff]  ;;  %v160_v35 = vld [vmem:[#allocation8 + $0x80] sm:$0x1]  ;;  %v147_v39 = vld [vmem:[#allocation8 + $0x18] sm:$0xff] }
  0x14   :  { %233 = vmatmul.msk.f32.vlgmr.msra.gmra.mxu0 %vm68_vm1, %v64_v3  ;;  %175 = vmatpush.msra.mxu1 %v157_v14  ;;  %v148_v37 = vld [vmem:[#allocation8 + $0x20] sm:$0xff]  ;;  %v146_v40 = vld [vmem:[#allocation8 + $0x10] sm:$0xff]  ;;  %v145_v42 = vld [vmem:[#allocation8 + $0x8] sm:$0xff] }
  0x15   :  { %235 = vmatpush.msk.msra.mxu2 %vm72_vm0, %v160_v35  ;;  %v144_v44 = vld [vmem:[#allocation8] sm:$0xff] }
  0x16   :  { %176 = vmatpush.msra.mxu1 %v156_v17 }
  0x18   :  { %177 = vmatpush.msra.mxu1 %v155_v19 }
  0x1a   :  { %178 = vmatpush.msra.mxu1 %v154_v22 }
  0x1c   :  { %179 = vmatpush.msra.mxu1 %v153_v24 }
  0x1e   :  { %180 = vmatpush.msra.mxu1 %v152_v27 }
  0x20   :  { %181 = vmatpush.msra.mxu1 %v151_v28 }
  0x22   :  { %182 = vmatpush.msra.mxu1 %v150_v30 }
  0x24   :  { %183 = vmatpush.msra.mxu1 %v149_v34 }
  0x26   :  { %184 = vmatpush.msra.mxu1 %v148_v37 }
  0x28   :  { %185 = vmatpush.msra.mxu1 %v147_v39 }
  0x2a   :  { %186 = vmatpush.msra.mxu1 %v146_v40 }
  0x2c   :  { %187 = vmatpush.msra.mxu1 %v145_v42 }
  0x2e   :  { %188 = vmatpush.msra.mxu1 %v144_v44 }
  0x91   :  { %v385_v4 = vpop.f32.mrf.mxu0 }
  0x92   :  { %v388_v5 = vmul.f32 0.70710677, %v385_v4  ;;  %v96_v59 = vmul.f32 0.5, %v385_v4 }
  0x94   :  { %v98_v6 = vmul.f32 %v388_v5, %v388_v5 }
  0x96   :  { %v99_v7 = vmin.f32 %v98_v6, 16.0 }
  0x98   :  { %v100_v9 = vmul.f32 2.1237322e-06, %v99_v7  ;;  %v111_v10 = vmul.f32 3.8918573e-05, %v99_v7 }
  0x9a   :  { %v101_v12 = vadd.f32 0.00028619796, %v100_v9  ;;  %v112_v13 = vadd.f32 0.001143296, %v111_v10 }
  0x9c   :  { %v102_v15 = vmul.f32 %v101_v12, %v99_v7  ;;  %v113_v16 = vmul.f32 %v112_v13, %v99_v7 }
  0x9e   :  { %v114_v18 = vadd.f32 0.014752088, %v113_v16  ;;  %v103_v20 = vadd.f32 0.0036580483, %v102_v15 }
  0xa0   :  { %v115_v21 = vmul.f32 %v114_v18, %v99_v7  ;;  %v104_v25 = vmul.f32 %v103_v20, %v99_v7 }
  0xa2   :  { %v116_v23 = vadd.f32 0.112945676, %v115_v21  ;;  %v105_v31 = vadd.f32 0.05243302, %v104_v25 }
  0xa4   :  { %v117_v26 = vmul.f32 %v116_v23, %v99_v7  ;;  %v106_v38 = vmul.f32 %v105_v31, %v99_v7 }
  0xa6   :  { %v118_v29 = vadd.f32 0.4994258, %v117_v26  ;;  %v107_v41 = vadd.f32 0.18741608, %v106_v38 }
  0xa8   :  { %v119_v33 = vmul.f32 %v118_v29, %v99_v7  ;;  %v108_v45 = vmul.f32 %v107_v41, %v99_v7 }
  0xaa   :  { %v120_v36 = vadd.f32 1.0, %v119_v33  ;;  %v109_v49 = vadd.f32 1.1283791, %v108_v45 }
  0xac   :  { %244 = vrcp.f32 %v120_v36  ;;  %v132_v48 = vand.u32 2147483648, %v120_v36  ;;  %v130_v51 = vand.u32 2147483647, %v120_v36  ;;  %vm126_vm4 = vweird.f32 %v120_v36 }
  0xad   :  { %v110_v54 = vmul.f32 %v109_v49, %v388_v5 }
  0xae   :  { %v133_v53 = vor.u32 1.1754944e-38, %v132_v48  ;;  %vm131_vm6 = vcmp.eq.f32.partialorder %v130_v51, 8.507059e+37 }
  0xb2   :  { %v245_v43 = vpop.eup %244 }
  0xb3   :  { %v122_v46 = vmul.f32 %v245_v43, %v120_v36  ;;  %vm127_vm3 = vweird.f32 %v245_v43 }
  0xb4   :  { %vm128_vm5 = vmor %vm126_vm4, %vm127_vm3 }
  0xb5   :  { %v123_v47 = vsub.f32 1.0, %v122_v46 }
  0xb7   :  { %v124_v50 = vmul.f32 %v245_v43, %v123_v47 }
  0xb9   :  { %v125_v52 = vadd.f32 %v245_v43, %v124_v50 }
  0xbb   :  { %v129_v55 = vsel %vm128_vm5, %v245_v43, %v125_v52 }
  0xbc   :  { %v134_v56 = vsel %vm131_vm6, %v133_v53, %v129_v55 }
  0xbd   :  { %v135_v57 = vmul.f32 %v134_v56, %v110_v54 }
  0xbf   :  { %v234_v58 = vclamps-f32 %v135_v57, 1.0 }
  0xc1   :  { %v138_v60 = vadd.f32 1.0, %v234_v58 }
  0xc3   :  { %v139_v61 = vmul.f32 %v138_v60, %v96_v59 }
  0xc5   :  { %140 = vst [vmem:[#allocation2] sm:$0xf] %v139_v61 }
  0xcc   :  { %v143_v62 = vld [vmem:[#allocation2] sm:$0xff] }
  0xcd   :  { %162 = vst [vmem:[#allocation1] ss:$2 sm:$0xff] %v143_v62 }
  0xd4   :  { %v163_v63 = vld.sshfl [vmem:[#allocation1] sm:$0xff pattern:$0x75316420]  ;;  %v164_v0 = vld.sshfl [vmem:[#allocation1 + $0x8] sm:$0xff pattern:$0x75316420] }
  0xd5   :  { %189 = vmatmul.f32.vlgmr.msra.gmra.mxu1 %v163_v63  ;;  %236 = vmatmul.msk.f32.vlgmr.msra.gmra.mxu2 %vm166_vm7, %v164_v0 }
 0x152   :  { %v190_v1 = vpop.f32.mrf.mxu1 }
 0x158   :  { %v210_v2 = vpop.f32.mrf.mxu2 }
 0x159   :  { %v211_v3 = vadd.f32 %v210_v2, %v190_v1 }
 0x15b   :  { %213 = vst [vmem:[#allocation9] sm:$0xf] %v211_v3 }
 0x15c   :  { %224 = dma.vmem_to_hbm [thread:$0]  %s220_s2, 64, %s222_s30, [#allocation5]  }
 0x15d   :  { %346 = dma.done.wait [#allocation5], 64  }
 0x15e   :  { %347 = vsyncadd [#allocation5], 4294967232 }
 0x15f   :  { %229 = vsyncpa [#allocation4], 1 }
 0x160   :  { %230 = vsyncpa [#allocation7], 1 }
 0x161   :  { %231 = vsyncpa [#allocation5], 1 }

// kernel: tpu_custom_call.1
= control target key start
LH: loop header
LB: loop body
LE: loop exit
PB: predicated region body
PF: predicated region fallthrough
CT: control target
= control target key end

     0   :  { %8 = vsyncpa [#allocation4], 0  ;;  %s398_s0 = inlined_call_operand.hbm [shape: f32[4,17], index: 0, kind: input, shape index: {}]   ;;  %s399_s1 = inlined_call_operand.hbm [shape: f32[17,128], index: 1, kind: input, shape index: {}]   ;;  %s400_s2 = inlined_call_operand.hbm [shape: f32[129,128], index: 2, kind: input, shape index: {}]   ;;  %s401_s3 = inlined_call_operand.hbm [shape: f32[4,128], index: 3, kind: output, shape index: {}]  }
   0x1   :  { %9 = vsyncpa [#allocation7], 0  ;;  %s26_s14 = sshll.u32 %s399_s1, 4  ;;  %s27_s14 = int_to_ptr.hbm [resolvable:$true] %s26_s14 }
   0x2   :  { %10 = vsyncpa [#allocation5], 0  ;;  %s348_s15 = smov [#allocation6]   ;;  %s16_s19 = sshll.u32 %s398_s0, 4  ;;  %s17_s19 = int_to_ptr.hbm [resolvable:$true] %s16_s19 }
   0x3   :  { %s28_s16 = sshll.u32 %s348_s15, 4  ;;  %s349_s20 = smov 128   ;;  %s29_s16 = int_to_ptr.vmem [resolvable:$true] %s28_s16 }
   0x4   :  { %s350_s21 = smov 8   ;;  %s351_s22 = smov [#allocation3]  }
   0x5   :  { %34 = dma.hbm_to_vmem [thread:$0]  %s27_s14, 384, %s29_s16, [#allocation7], %s349_s20, %s349_s20, %s350_s21  }
   0x6   :  { %s18_s23 = sshll.u32 %s351_s22, 4  ;;  %s39_s26 = sshll.u32 %s400_s2, 4  ;;  %s19_s23 = int_to_ptr.vmem [resolvable:$true] %s18_s23  ;;  %s40_s26 = int_to_ptr.hbm [resolvable:$true] %s39_s26 }
   0x7   :  { %21 = dma.hbm_to_vmem [thread:$0]  %s17_s19, 64, %s19_s23, [#allocation4]  }
   0x8   :  { %s352_s1 = smov [#allocation8]  }
   0x9   :  { %s41_s27 = sshll.u32 %s352_s1, 4  ;;  %s42_s27 = int_to_ptr.vmem [resolvable:$true] %s41_s27 }
   0xa   :  { %47 = dma.hbm_to_vmem [thread:$0]  %s40_s26, 2176, %s42_s27, [#allocation7], %s349_s20, %s349_s20, %s350_s21  }
   0xb   :  { %342 = dma.done.wait [#allocation4], 64  }
   0xc   :  { %343 = vsyncadd [#allocation4], 4294967232 }
   0xd   :  { %344 = dma.done.wait [#allocation7], 2560  }
   0xe   :  { %345 = vsyncadd [#allocation7], 4294964736  ;;  %vm72_vm0 = vcmask 1040384   ;;  %v67_v0 = vld [vmem:[#allocation6 + $0x10] sm:$0x1]  ;;  %v66_v1 = vld [vmem:[#allocation6 + $0x8] sm:$0xff] }
   0xf   :  { %232 = vmatpush.msk.msra.mxu0 %vm72_vm0, %v67_v0  ;;  %v65_v2 = vld [vmem:[#allocation6] sm:$0xff]  ;;  %v64_v3 = vld [vmem:[#allocation3] sm:$0xf]  ;;  %vm68_vm1 = vcmask 138240   ;;  %v159_v8 = vld [vmem:[#allocation8 + $0x78] sm:$0xff]  ;;  %vm141_vm2 = vcmask 3072  }
  0x10   :  { %173 = vmatpush.msra.mxu1 %v159_v8  ;;  %v158_v11 = vld [vmem:[#allocation8 + $0x70] sm:$0xff]  ;;  %v157_v14 = vld [vmem:[#allocation8 + $0x68] sm:$0xff]  ;;  %v156_v17 = vld [vmem:[#allocation8 + $0x60] sm:$0xff]  ;;  %v353_v32 = vmov 1.0   ;;  %vm166_vm7 = vcmask 7168   ;;  %s354_s0 = smov [#allocation9]  }
  0x11   :  { %90 = vmatpush.msra.mxu0 %v66_v1  ;;  %v155_v19 = vld [vmem:[#allocation8 + $0x58] sm:$0xff]  ;;  %v154_v22 = vld [vmem:[#allocation8 + $0x50] sm:$0xff]  ;;  %v153_v24 = vld [vmem:[#allocation8 + $0x48] sm:$0xff]  ;;  %142 = vst.msk [vmem:[#allocation2 + $0x4] sm:$0xf] %vm141_vm2, %v353_v32  ;;  %s219_s2 = sshll.u32 %s354_s0, 4  ;;  %s220_s2 = int_to_ptr.vmem [resolvable:$true] %s219_s2 }
  0x12   :  { %174 = vmatpush.msra.mxu1 %v158_v11  ;;  %v152_v27 = vld [vmem:[#allocation8 + $0x40] sm:$0xff]  ;;  %v151_v28 = vld [vmem:[#allocation8 + $0x38] sm:$0xff]  ;;  %v150_v30 = vld [vmem:[#allocation8 + $0x30] sm:$0xff]  ;;  %s221_s30 = sshll.u32 %s401_s3, 4  ;;  %s222_s30 = int_to_ptr.hbm [resolvable:$true] %s221_s30 }
  0x13   :  { %91 = vmatpush.msra.mxu0 %v65_v2  ;;  %v149_v34 = vld [vmem:[#allocation8 + $0x28] sm:$0xff]  ;;  %v160_v35 = vld [vmem:[#allocation8 + $0x80] sm:$0x1]  ;;  %v147_v39 = vld [vmem:[#allocation8 + $0x18] sm:$0xff] }
  0x14   :  { %233 = vmatmul.msk.f32.vlgmr.msra.gmra.mxu0 %vm68_vm1, %v64_v3  ;;  %175 = vmatpush.msra.mxu1 %v157_v14  ;;  %v148_v37 = vld [vmem:[#allocation8 + $0x20] sm:$0xff]  ;;  %v146_v40 = vld [vmem:[#allocation8 + $0x10] sm:$0xff]  ;;  %v145_v42 = vld [vmem:[#allocation8 + $0x8] sm:$0xff] }
  0x15   :  { %235 = vmatpush.msk.msra.mxu2 %vm72_vm0, %v160_v35  ;;  %v144_v44 = vld [vmem:[#allocation8] sm:$0xff] }
  0x16   :  { %176 = vmatpush.msra.mxu1 %v156_v17 }
  0x18   :  { %177 = vmatpush.msra.mxu1 %v155_v19 }
  0x1a   :  { %178 = vmatpush.msra.mxu1 %v154_v22 }
  0x1c   :  { %179 = vmatpush.msra.mxu1 %v153_v24 }
  0x1e   :  { %180 = vmatpush.msra.mxu1 %v152_v27 }
  0x20   :  { %181 = vmatpush.msra.mxu1 %v151_v28 }
  0x22   :  { %182 = vmatpush.msra.mxu1 %v150_v30 }
  0x24   :  { %183 = vmatpush.msra.mxu1 %v149_v34 }
  0x26   :  { %184 = vmatpush.msra.mxu1 %v148_v37 }
  0x28   :  { %185 = vmatpush.msra.mxu1 %v147_v39 }
  0x2a   :  { %186 = vmatpush.msra.mxu1 %v146_v40 }
  0x2c   :  { %187 = vmatpush.msra.mxu1 %v145_v42 }
  0x2e   :  { %188 = vmatpush.msra.mxu1 %v144_v44 }
  0x91   :  { %v385_v4 = vpop.f32.mrf.mxu0 }
  0x92   :  { %v388_v5 = vmul.f32 0.70710677, %v385_v4  ;;  %v96_v59 = vmul.f32 0.5, %v385_v4 }
  0x94   :  { %v98_v6 = vmul.f32 %v388_v5, %v388_v5 }
  0x96   :  { %v99_v7 = vmin.f32 %v98_v6, 16.0 }
  0x98   :  { %v100_v9 = vmul.f32 2.1237322e-06, %v99_v7  ;;  %v111_v10 = vmul.f32 3.8918573e-05, %v99_v7 }
  0x9a   :  { %v101_v12 = vadd.f32 0.00028619796, %v100_v9  ;;  %v112_v13 = vadd.f32 0.001143296, %v111_v10 }
  0x9c   :  { %v102_v15 = vmul.f32 %v101_v12, %v99_v7  ;;  %v113_v16 = vmul.f32 %v112_v13, %v99_v7 }
  0x9e   :  { %v114_v18 = vadd.f32 0.014752088, %v113_v16  ;;  %v103_v20 = vadd.f32 0.0036580483, %v102_v15 }
  0xa0   :  { %v115_v21 = vmul.f32 %v114_v18, %v99_v7  ;;  %v104_v25 = vmul.f32 %v103_v20, %v99_v7 }
  0xa2   :  { %v116_v23 = vadd.f32 0.112945676, %v115_v21  ;;  %v105_v31 = vadd.f32 0.05243302, %v104_v25 }
  0xa4   :  { %v117_v26 = vmul.f32 %v116_v23, %v99_v7  ;;  %v106_v38 = vmul.f32 %v105_v31, %v99_v7 }
  0xa6   :  { %v118_v29 = vadd.f32 0.4994258, %v117_v26  ;;  %v107_v41 = vadd.f32 0.18741608, %v106_v38 }
  0xa8   :  { %v119_v33 = vmul.f32 %v118_v29, %v99_v7  ;;  %v108_v45 = vmul.f32 %v107_v41, %v99_v7 }
  0xaa   :  { %v120_v36 = vadd.f32 1.0, %v119_v33  ;;  %v109_v49 = vadd.f32 1.1283791, %v108_v45 }
  0xac   :  { %244 = vrcp.f32 %v120_v36  ;;  %v132_v48 = vand.u32 2147483648, %v120_v36  ;;  %v130_v51 = vand.u32 2147483647, %v120_v36  ;;  %vm126_vm4 = vweird.f32 %v120_v36 }
  0xad   :  { %v110_v54 = vmul.f32 %v109_v49, %v388_v5 }
  0xae   :  { %v133_v53 = vor.u32 1.1754944e-38, %v132_v48  ;;  %vm131_vm6 = vcmp.eq.f32.partialorder %v130_v51, 8.507059e+37 }
  0xb2   :  { %v245_v43 = vpop.eup %244 }
  0xb3   :  { %v122_v46 = vmul.f32 %v245_v43, %v120_v36  ;;  %vm127_vm3 = vweird.f32 %v245_v43 }
  0xb4   :  { %vm128_vm5 = vmor %vm126_vm4, %vm127_vm3 }
  0xb5   :  { %v123_v47 = vsub.f32 1.0, %v122_v46 }
  0xb7   :  { %v124_v50 = vmul.f32 %v245_v43, %v123_v47 }
  0xb9   :  { %v125_v52 = vadd.f32 %v245_v43, %v124_v50 }
  0xbb   :  { %v129_v55 = vsel %vm128_vm5, %v245_v43, %v125_v52 }
  0xbc   :  { %v134_v56 = vsel %vm131_vm6, %v133_v53, %v129_v55 }
  0xbd   :  { %v135_v57 = vmul.f32 %v134_v56, %v110_v54 }
  0xbf   :  { %v234_v58 = vclamps-f32 %v135_v57, 1.0 }
  0xc1   :  { %v138_v60 = vadd.f32 1.0, %v234_v58 }
  0xc3   :  { %v139_v61 = vmul.f32 %v138_v60, %v96_v59 }
  0xc5   :  { %140 = vst [vmem:[#allocation2] sm:$0xf] %v139_v61 }
  0xcc   :  { %v143_v62 = vld [vmem:[#allocation2] sm:$0xff] }
  0xcd   :  { %162 = vst [vmem:[#allocation1] ss:$2 sm:$0xff] %v143_v62 }
  0xd4   :  { %v163_v63 = vld.sshfl [vmem:[#allocation1] sm:$0xff pattern:$0x75316420]  ;;  %v164_v0 = vld.sshfl [vmem:[#allocation1 + $0x8] sm:$0xff pattern:$0x75316420] }
  0xd5   :  { %189 = vmatmul.f32.vlgmr.msra.gmra.mxu1 %v163_v63  ;;  %236 = vmatmul.msk.f32.vlgmr.msra.gmra.mxu2 %vm166_vm7, %v164_v0 }
 0x152   :  { %v190_v1 = vpop.f32.mrf.mxu1 }
 0x158   :  { %v210_v2 = vpop.f32.mrf.mxu2 }
 0x159   :  { %v211_v3 = vadd.f32 %v210_v2, %v190_v1 }
 0x15b   :  { %213 = vst [vmem:[#allocation9] sm:$0xf] %v211_v3 }
 0x15c   :  { %224 = dma.vmem_to_hbm [thread:$0]  %s220_s2, 64, %s222_s30, [#allocation5]  }
 0x15d   :  { %346 = dma.done.wait [#allocation5], 64  }
 0x15e   :  { %347 = vsyncadd [#allocation5], 4294967232 }
 0x15f   :  { %229 = vsyncpa [#allocation4], 1 }
 0x160   :  { %230 = vsyncpa [#allocation7], 1 }
 0x161   :  { %231 = vsyncpa [#allocation5], 1 }

</bundles_post_ra>
